<compile_context>
chip_gen: v6e
topology: v6e:2x2x1
jax: 0.10.0
libtpu: 0.0.40
codegen_flags: <defaults>
</compile_context>

<pallas_src>
import math

import jax
import jax.numpy as jnp
from jax import lax
from jax.experimental import pallas as pl
from jax.experimental.pallas import tpu as pltpu

_LANE = 128
_SUBLANE = 8


def _round_up(x, m):
    return (x + m - 1) // m * m


# -----------------------------------------------------------------------------
# Sinusoidal time encoding (matches `time_encoding` in the PyTorch code)
# -----------------------------------------------------------------------------
def time_encoding(time_steps, dimension):
    assert dimension % 2 == 0, "time_encoding requires an even dimension"
    position = time_steps[:, None].astype(jnp.float32)                # [T, 1]
    div_term = jnp.exp(
        jnp.arange(0, dimension, 2, dtype=jnp.float32)
        * (-math.log(10000.0) / dimension)
    )                                                                  # [dim/2]
    pe = jnp.zeros((time_steps.shape[0], dimension), jnp.float32)
    pe = pe.at[:, 0::2].set(jnp.sin(position * div_term))
    pe = pe.at[:, 1::2].set(jnp.cos(position * div_term))
    return pe


# -----------------------------------------------------------------------------
# GELU variants (computed in f32)
# -----------------------------------------------------------------------------
def _gelu_erf(x):
    # Exact erf formulation (PyTorch F.gelu default) — VALU polynomial.
    return 0.5 * x * (1.0 + lax.erf(x * 0.7071067811865475))


def _gelu_tanh(x):
    # tanh approximation — runs on the EUP slot, which is otherwise idle here.
    c = 0.7978845608028654  # sqrt(2/pi)
    return 0.5 * x * (1.0 + jnp.tanh(c * (x + 0.044715 * (x * x * x))))


# -----------------------------------------------------------------------------
# Pallas kernel: fused 6-layer MLP (input_layer, linear1..4, output_layer)
# -----------------------------------------------------------------------------
def _make_mlp_kernel(approx_gelu):
    act = _gelu_tanh if approx_gelu else _gelu_erf

    def kernel(s_ref, a_ref,
               w0s_ref, w0a_ref, tb0_ref,
               w1_ref, b1_ref,
               w2_ref, b2_ref,
               w3_ref, b3_ref,
               w4_ref, b4_ref,
               w5_ref, b5_ref,
               o_ref):
        def layer(y_bf16, w_ref, b_ref):
            # bf16 inputs, f32 accumulation + f32 bias.
            return jnp.dot(y_bf16, w_ref[...],
                           preferred_element_type=jnp.float32) + b_ref[...]

        # Layer 0: state/action contributions; the (single, broadcast) time
        # embedding contribution and the bias are pre-folded into tb0.
        y = (jnp.dot(s_ref[...], w0s_ref[...], preferred_element_type=jnp.float32)
             + jnp.dot(a_ref[...], w0a_ref[...], preferred_element_type=jnp.float32)
             + tb0_ref[...])
        y = act(y).astype(jnp.bfloat16)
        y = act(layer(y, w1_ref, b1_ref)).astype(jnp.bfloat16)
        y = act(layer(y, w2_ref, b2_ref)).astype(jnp.bfloat16)
        y = act(layer(y, w3_ref, b3_ref)).astype(jnp.bfloat16)
        y = act(layer(y, w4_ref, b4_ref)).astype(jnp.bfloat16)
        y = layer(y, w5_ref, b5_ref)
        o_ref[...] = y.astype(o_ref.dtype)

    return kernel


# -----------------------------------------------------------------------------
# Generation-aware VMEM limit
# -----------------------------------------------------------------------------
def _vmem_limit_bytes():
    default = 48 * 1024 * 1024            # safe on every generation (v7x: 64 MiB)
    try:
        info = pltpu.get_tpu_info()
    except Exception:
        return default
    cap = None
    for name in ("vmem_capacity_bytes", "vmem_size_bytes", "vmem_bytes"):
        cap = getattr(info, name, None)
        if cap:
            break
    if not cap:
        return default
    if cap >= 96 * 1024 * 1024:           # v5e / v6e: 128 MiB physical VMEM
        return 100 * 1024 * 1024
    return 48 * 1024 * 1024               # v7x: 64 MiB physical per TensorCore


# -----------------------------------------------------------------------------
# Forward wrapper (equivalent of DIFFUSION.forward(state, action, t))
# -----------------------------------------------------------------------------
def diffusion_forward(params, state, action, t, time_dim, *,
                      batch_tile=None, approx_gelu=True):
    (w0, b0), (w1, b1), (w2, b2), (w3, b3), (w4, b4), (w5, b5) = params

    B, state_dim = state.shape
    action_dim_in = action.shape[1]
    unit = w0.shape[1]
    action_dim = w5.shape[1]
    d_sa = state_dim + action_dim_in

    # The time-embedding fold assumes a single timestep broadcast over the batch
    # (exactly what the torch `t_emb.repeat(state.size(0), 1)` + cat requires).
    assert t.shape[0] == 1, "diffusion_forward expects a single broadcast timestep"

    t_emb = time_encoding(t.astype(jnp.float32), time_dim)            # [1, time_dim]
    tb0 = t_emb @ w0[d_sa:, :] + b0                                    # [1, unit], f32

    # Lane-width padding of the hidden / output feature dims.
    U_pad = _round_up(unit, _LANE)
    A_pad = _round_up(action_dim, _LANE)

    # Batch tile: multiple of 8 sublanes, capped at 512 rows; for larger
    # batches pick >=2 grid steps so "parallel" can shard across TensorCores.
    B8 = _round_up(B, _SUBLANE)
    if batch_tile is None:
        if B8 <= 128:
            batch_tile = B8
        else:
            batch_tile = min(512, _round_up(-(-B8 // 2), 16))
    B_pad = _round_up(B, batch_tile)

    # Activations: batch-pad only (feature dims stay at their true width so we
    # avoid the padded-concat HBM round trip), cast to bf16.
    s_bf16 = jnp.pad(state, ((0, B_pad - B), (0, 0))).astype(jnp.bfloat16)
    a_bf16 = jnp.pad(action, ((0, B_pad - B), (0, 0))).astype(jnp.bfloat16)

    def pad_w(w, rows, cols):
        return jnp.pad(w, ((0, rows - w.shape[0]),
                           (0, cols - w.shape[1]))).astype(jnp.bfloat16)

    def pad_b(b, cols):
        return jnp.pad(b, ((0, 0), (0, cols - b.shape[1]))).astype(jnp.float32)

    w0s = pad_w(w0[:state_dim, :], state_dim, U_pad)
    w0a = pad_w(w0[state_dim:d_sa, :], action_dim_in, U_pad)
    tb0p = pad_b(tb0, U_pad)
    w1p = pad_w(w1, U_pad, U_pad)
    w2p = pad_w(w2, U_pad, U_pad)
    w3p = pad_w(w3, U_pad, U_pad)
    w4p = pad_w(w4, U_pad, U_pad)
    b1p = pad_b(b1, U_pad)
    b2p = pad_b(b2, U_pad)
    b3p = pad_b(b3, U_pad)
    b4p = pad_b(b4, U_pad)
    w5p = pad_w(w5, U_pad, A_pad)
    b5p = pad_b(b5, A_pad)

    grid = (B_pad // batch_tile,)

    # Activation tiles walk the batch axis (auto double-buffered); weights and
    # biases are full-array VMEM-resident operands (single copy, no pipeline
    # buffers — halves the resident weight footprint vs. a constant index_map).
    s_spec = pl.BlockSpec((batch_tile, state_dim), lambda i: (i, 0))
    a_spec = pl.BlockSpec((batch_tile, action_dim_in), lambda i: (i, 0))
    out_spec = pl.BlockSpec((batch_tile, A_pad), lambda i: (i, 0))
    resident = pl.BlockSpec(memory_space=pltpu.MemorySpace.VMEM)

    in_specs = [s_spec, a_spec] + [resident] * 13

    weight_elems = (state_dim + action_dim_in) * U_pad + 4 * U_pad * U_pad + U_pad * A_pad
    cost = pl.CostEstimate(
        flops=2 * B_pad * weight_elems,
        transcendentals=5 * B_pad * U_pad,
        bytes_accessed=(B_pad * (state_dim + action_dim_in) * 2   # bf16 activations in
                        + weight_elems * 2                        # bf16 weights
                        + (6 * U_pad + A_pad) * 4                 # f32 biases / tb0
                        + B_pad * A_pad * 4),                     # f32 output
    )

    kernel = pl.pallas_call(
        _make_mlp_kernel(approx_gelu),
        out_shape=jax.ShapeDtypeStruct((B_pad, A_pad), jnp.float32),
        grid=grid,
        in_specs=in_specs,
        out_specs=out_spec,
        compiler_params=pltpu.CompilerParams(
            dimension_semantics=("parallel",),
            vmem_limit_bytes=_vmem_limit_bytes(),
        ),
        cost_estimate=cost,
    )

    out = kernel(s_bf16, a_bf16,
                 w0s, w0a, tb0p,
                 w1p, b1p, w2p, b2p, w3p, b3p, w4p, b4p,
                 w5p, b5p)
    return out[:B, :action_dim]


# -----------------------------------------------------------------------------
# Deterministic parameter init (same shapes as the torch.nn.Linear layers)
# -----------------------------------------------------------------------------
def init_params(key, state_dim, action_dim, time_dim, unit):
    d_in = state_dim + action_dim + time_dim
    sizes = [(d_in, unit), (unit, unit), (unit, unit),
             (unit, unit), (unit, unit), (unit, action_dim)]
    params = []
    for (fan_in, fan_out) in sizes:
        key, kw, kb = jax.random.split(key, 3)
        bound = 1.0 / math.sqrt(fan_in)
        w = jax.random.uniform(kw, (fan_in, fan_out), jnp.float32, -bound, bound)
        b = jax.random.uniform(kb, (1, fan_out), jnp.float32, -bound, bound)
        params.append((w, b))
    return params


# -----------------------------------------------------------------------------
# Pure-JAX f32 reference (exact semantics of the PyTorch module)
# -----------------------------------------------------------------------------
def reference_forward(params, state, action, t, time_dim):
    B = state.shape[0]
    t_emb = time_encoding(t.astype(jnp.float32), time_dim)
    t_emb = jnp.tile(t_emb, (B, 1))
    x = jnp.concatenate([state, action, t_emb], axis=1)
    for i, (w, b) in enumerate(params):
        x = x @ w + b
        if i < len(params) - 1:
            x = _gelu_erf(x)
    return x


if __name__ == "__main__":
    # Small shapes consistent with the module (scaled-down time_dim / unit).
    B = 8
    state_dim = 8
    action_dim = 8
    time_dim = 32
    unit = 32

    key = jax.random.PRNGKey(0)
    kp, ks, ka = jax.random.split(key, 3)

    params = init_params(kp, state_dim, action_dim, time_dim, unit)
    state = jax.random.normal(ks, (B, state_dim), jnp.float32)
    action = jax.random.normal(ka, (B, action_dim), jnp.float32)
    # A single diffusion timestep (t.size(0) == 1, as the torch cat requires).
    t = jnp.array([7.0], dtype=jnp.float32)

    out = diffusion_forward(params, state, action, t, time_dim)
    out = jax.block_until_ready(out)

    ref = reference_forward(params, state, action, t, time_dim)
    assert out.shape == (B, action_dim)
    # bf16 matmul inputs (f32 accumulation) + tanh-GELU -> loosened tolerance
    # vs the f32/erf reference.
    max_err = float(jnp.max(jnp.abs(out - ref)))
    assert max_err < 5e-2, f"mismatch vs reference: max |err| = {max_err}"

    print("KERNEL_OK")
</pallas_src>

<mosaic_0001>
module attributes {stable_mosaic.version = 11 : i64} {
  func.func @kernel(%arg0: i32, %arg1: memref<8x8xbf16, #tpu.memory_space<vmem>>, %arg2: memref<8x8xbf16, #tpu.memory_space<vmem>>, %arg3: memref<8x128xbf16, #tpu.memory_space<vmem>>, %arg4: memref<8x128xbf16, #tpu.memory_space<vmem>>, %arg5: memref<1x128xf32, #tpu.memory_space<vmem>>, %arg6: memref<128x128xbf16, #tpu.memory_space<vmem>>, %arg7: memref<1x128xf32, #tpu.memory_space<vmem>>, %arg8: memref<128x128xbf16, #tpu.memory_space<vmem>>, %arg9: memref<1x128xf32, #tpu.memory_space<vmem>>, %arg10: memref<128x128xbf16, #tpu.memory_space<vmem>>, %arg11: memref<1x128xf32, #tpu.memory_space<vmem>>, %arg12: memref<128x128xbf16, #tpu.memory_space<vmem>>, %arg13: memref<1x128xf32, #tpu.memory_space<vmem>>, %arg14: memref<128x128xbf16, #tpu.memory_space<vmem>>, %arg15: memref<1x128xf32, #tpu.memory_space<vmem>>, %arg16: memref<8x128xf32, #tpu.memory_space<vmem>>) attributes {dimension_semantics = [#tpu.dimension_semantics<parallel>], iteration_bounds = array<i64: 1>, scalar_prefetch = 0 : i64, scratch_operands = 0 : i64, tpu.core_type = #tpu.core_type<tc>, window_params = [{transform_indices = @transform_0, window_bounds = array<i64: 8, 8>}, {transform_indices = @transform_1, window_bounds = array<i64: 8, 8>}, {pipeline_mode = #tpu.pipeline_mode<synchronous>, transform_indices = @transform_2, window_bounds = array<i64: 8, 128>}, {pipeline_mode = #tpu.pipeline_mode<synchronous>, transform_indices = @transform_3, window_bounds = array<i64: 8, 128>}, {pipeline_mode = #tpu.pipeline_mode<synchronous>, transform_indices = @transform_4, window_bounds = array<i64: 1, 128>}, {pipeline_mode = #tpu.pipeline_mode<synchronous>, transform_indices = @transform_5, window_bounds = array<i64: 128, 128>}, {pipeline_mode = #tpu.pipeline_mode<synchronous>, transform_indices = @transform_6, window_bounds = array<i64: 1, 128>}, {pipeline_mode = #tpu.pipeline_mode<synchronous>, transform_indices = @transform_7, window_bounds = array<i64: 128, 128>}, {pipeline_mode = #tpu.pipeline_mode<synchronous>, transform_indices = @transform_8, window_bounds = array<i64: 1, 128>}, {pipeline_mode = #tpu.pipeline_mode<synchronous>, transform_indices = @transform_9, window_bounds = array<i64: 128, 128>}, {pipeline_mode = #tpu.pipeline_mode<synchronous>, transform_indices = @transform_10, window_bounds = array<i64: 1, 128>}, {pipeline_mode = #tpu.pipeline_mode<synchronous>, transform_indices = @transform_11, window_bounds = array<i64: 128, 128>}, {pipeline_mode = #tpu.pipeline_mode<synchronous>, transform_indices = @transform_12, window_bounds = array<i64: 1, 128>}, {pipeline_mode = #tpu.pipeline_mode<synchronous>, transform_indices = @transform_13, window_bounds = array<i64: 128, 128>}, {pipeline_mode = #tpu.pipeline_mode<synchronous>, transform_indices = @transform_14, window_bounds = array<i64: 1, 128>}, {transform_indices = @transform_15, window_bounds = array<i64: 8, 128>}]} {
    %c0 = arith.constant 0 : index
    %c0_0 = arith.constant 0 : index
    %0 = vector.load %arg1[%c0, %c0_0] : memref<8x8xbf16, #tpu.memory_space<vmem>>, vector<8x8xbf16>
    %c0_1 = arith.constant 0 : index
    %c0_2 = arith.constant 0 : index
    %1 = vector.load %arg3[%c0_1, %c0_2] : memref<8x128xbf16, #tpu.memory_space<vmem>>, vector<8x128xbf16>
    %cst = arith.constant dense<0.000000e+00> : vector<8x128xf32>
    %2 = tpu.matmul %0, %1, %cst {dimension_numbers = #tpu.dot_dimension_numbers<[1], [0], [0], [1], [0, 0, 1, 1], [], []>} : vector<8x8xbf16>, vector<8x128xbf16>, vector<8x128xf32> -> vector<8x128xf32>
    %c0_3 = arith.constant 0 : index
    %c0_4 = arith.constant 0 : index
    %3 = vector.load %arg2[%c0_3, %c0_4] : memref<8x8xbf16, #tpu.memory_space<vmem>>, vector<8x8xbf16>
    %c0_5 = arith.constant 0 : index
    %c0_6 = arith.constant 0 : index
    %4 = vector.load %arg4[%c0_5, %c0_6] : memref<8x128xbf16, #tpu.memory_space<vmem>>, vector<8x128xbf16>
    %cst_7 = arith.constant dense<0.000000e+00> : vector<8x128xf32>
    %5 = tpu.matmul %3, %4, %cst_7 {dimension_numbers = #tpu.dot_dimension_numbers<[1], [0], [0], [1], [0, 0, 1, 1], [], []>} : vector<8x8xbf16>, vector<8x128xbf16>, vector<8x128xf32> -> vector<8x128xf32>
    %6 = arith.addf %2, %5 : vector<8x128xf32>
    %c0_8 = arith.constant 0 : index
    %c0_9 = arith.constant 0 : index
    %7 = vector.load %arg5[%c0_8, %c0_9] : memref<1x128xf32, #tpu.memory_space<vmem>>, vector<1x128xf32>
    %8 = vector.broadcast %7 : vector<1x128xf32> to vector<8x128xf32>
    %9 = arith.addf %6, %8 : vector<8x128xf32>
    %cst_10 = arith.constant 5.000000e-01 : f32
    %10 = vector.broadcast %cst_10 : f32 to vector<8x128xf32>
    %11 = arith.mulf %10, %9 : vector<8x128xf32>
    %12 = arith.mulf %9, %9 : vector<8x128xf32>
    %13 = arith.mulf %12, %9 : vector<8x128xf32>
    %cst_11 = arith.constant 4.471500e-02 : f32
    %14 = vector.broadcast %cst_11 : f32 to vector<8x128xf32>
    %15 = arith.mulf %14, %13 : vector<8x128xf32>
    %16 = arith.addf %9, %15 : vector<8x128xf32>
    %cst_12 = arith.constant 0.797884583 : f32
    %17 = vector.broadcast %cst_12 : f32 to vector<8x128xf32>
    %18 = arith.mulf %17, %16 : vector<8x128xf32>
    %19 = math.tanh %18 : vector<8x128xf32>
    %cst_13 = arith.constant 1.000000e+00 : f32
    %20 = vector.broadcast %cst_13 : f32 to vector<8x128xf32>
    %21 = arith.addf %20, %19 : vector<8x128xf32>
    %22 = arith.mulf %11, %21 : vector<8x128xf32>
    %23 = arith.truncf %22 : vector<8x128xf32> to vector<8x128xbf16>
    %c0_14 = arith.constant 0 : index
    %c0_15 = arith.constant 0 : index
    %24 = vector.load %arg6[%c0_14, %c0_15] : memref<128x128xbf16, #tpu.memory_space<vmem>>, vector<128x128xbf16>
    %cst_16 = arith.constant dense<0.000000e+00> : vector<8x128xf32>
    %25 = tpu.matmul %23, %24, %cst_16 {dimension_numbers = #tpu.dot_dimension_numbers<[1], [0], [0], [1], [0, 0, 1, 1], [], []>} : vector<8x128xbf16>, vector<128x128xbf16>, vector<8x128xf32> -> vector<8x128xf32>
    %c0_17 = arith.constant 0 : index
    %c0_18 = arith.constant 0 : index
    %26 = vector.load %arg7[%c0_17, %c0_18] : memref<1x128xf32, #tpu.memory_space<vmem>>, vector<1x128xf32>
    %27 = vector.broadcast %26 : vector<1x128xf32> to vector<8x128xf32>
    %28 = arith.addf %25, %27 : vector<8x128xf32>
    %cst_19 = arith.constant 5.000000e-01 : f32
    %29 = vector.broadcast %cst_19 : f32 to vector<8x128xf32>
    %30 = arith.mulf %29, %28 : vector<8x128xf32>
    %31 = arith.mulf %28, %28 : vector<8x128xf32>
    %32 = arith.mulf %31, %28 : vector<8x128xf32>
    %cst_20 = arith.constant 4.471500e-02 : f32
    %33 = vector.broadcast %cst_20 : f32 to vector<8x128xf32>
    %34 = arith.mulf %33, %32 : vector<8x128xf32>
    %35 = arith.addf %28, %34 : vector<8x128xf32>
    %cst_21 = arith.constant 0.797884583 : f32
    %36 = vector.broadcast %cst_21 : f32 to vector<8x128xf32>
    %37 = arith.mulf %36, %35 : vector<8x128xf32>
    %38 = math.tanh %37 : vector<8x128xf32>
    %cst_22 = arith.constant 1.000000e+00 : f32
    %39 = vector.broadcast %cst_22 : f32 to vector<8x128xf32>
    %40 = arith.addf %39, %38 : vector<8x128xf32>
    %41 = arith.mulf %30, %40 : vector<8x128xf32>
    %42 = arith.truncf %41 : vector<8x128xf32> to vector<8x128xbf16>
    %c0_23 = arith.constant 0 : index
    %c0_24 = arith.constant 0 : index
    %43 = vector.load %arg8[%c0_23, %c0_24] : memref<128x128xbf16, #tpu.memory_space<vmem>>, vector<128x128xbf16>
    %cst_25 = arith.constant dense<0.000000e+00> : vector<8x128xf32>
    %44 = tpu.matmul %42, %43, %cst_25 {dimension_numbers = #tpu.dot_dimension_numbers<[1], [0], [0], [1], [0, 0, 1, 1], [], []>} : vector<8x128xbf16>, vector<128x128xbf16>, vector<8x128xf32> -> vector<8x128xf32>
    %c0_26 = arith.constant 0 : index
    %c0_27 = arith.constant 0 : index
    %45 = vector.load %arg9[%c0_26, %c0_27] : memref<1x128xf32, #tpu.memory_space<vmem>>, vector<1x128xf32>
    %46 = vector.broadcast %45 : vector<1x128xf32> to vector<8x128xf32>
    %47 = arith.addf %44, %46 : vector<8x128xf32>
    %cst_28 = arith.constant 5.000000e-01 : f32
    %48 = vector.broadcast %cst_28 : f32 to vector<8x128xf32>
    %49 = arith.mulf %48, %47 : vector<8x128xf32>
    %50 = arith.mulf %47, %47 : vector<8x128xf32>
    %51 = arith.mulf %50, %47 : vector<8x128xf32>
    %cst_29 = arith.constant 4.471500e-02 : f32
    %52 = vector.broadcast %cst_29 : f32 to vector<8x128xf32>
    %53 = arith.mulf %52, %51 : vector<8x128xf32>
    %54 = arith.addf %47, %53 : vector<8x128xf32>
    %cst_30 = arith.constant 0.797884583 : f32
    %55 = vector.broadcast %cst_30 : f32 to vector<8x128xf32>
    %56 = arith.mulf %55, %54 : vector<8x128xf32>
    %57 = math.tanh %56 : vector<8x128xf32>
    %cst_31 = arith.constant 1.000000e+00 : f32
    %58 = vector.broadcast %cst_31 : f32 to vector<8x128xf32>
    %59 = arith.addf %58, %57 : vector<8x128xf32>
    %60 = arith.mulf %49, %59 : vector<8x128xf32>
    %61 = arith.truncf %60 : vector<8x128xf32> to vector<8x128xbf16>
    %c0_32 = arith.constant 0 : index
    %c0_33 = arith.constant 0 : index
    %62 = vector.load %arg10[%c0_32, %c0_33] : memref<128x128xbf16, #tpu.memory_space<vmem>>, vector<128x128xbf16>
    %cst_34 = arith.constant dense<0.000000e+00> : vector<8x128xf32>
    %63 = tpu.matmul %61, %62, %cst_34 {dimension_numbers = #tpu.dot_dimension_numbers<[1], [0], [0], [1], [0, 0, 1, 1], [], []>} : vector<8x128xbf16>, vector<128x128xbf16>, vector<8x128xf32> -> vector<8x128xf32>
    %c0_35 = arith.constant 0 : index
    %c0_36 = arith.constant 0 : index
    %64 = vector.load %arg11[%c0_35, %c0_36] : memref<1x128xf32, #tpu.memory_space<vmem>>, vector<1x128xf32>
    %65 = vector.broadcast %64 : vector<1x128xf32> to vector<8x128xf32>
    %66 = arith.addf %63, %65 : vector<8x128xf32>
    %cst_37 = arith.constant 5.000000e-01 : f32
    %67 = vector.broadcast %cst_37 : f32 to vector<8x128xf32>
    %68 = arith.mulf %67, %66 : vector<8x128xf32>
    %69 = arith.mulf %66, %66 : vector<8x128xf32>
    %70 = arith.mulf %69, %66 : vector<8x128xf32>
    %cst_38 = arith.constant 4.471500e-02 : f32
    %71 = vector.broadcast %cst_38 : f32 to vector<8x128xf32>
    %72 = arith.mulf %71, %70 : vector<8x128xf32>
    %73 = arith.addf %66, %72 : vector<8x128xf32>
    %cst_39 = arith.constant 0.797884583 : f32
    %74 = vector.broadcast %cst_39 : f32 to vector<8x128xf32>
    %75 = arith.mulf %74, %73 : vector<8x128xf32>
    %76 = math.tanh %75 : vector<8x128xf32>
    %cst_40 = arith.constant 1.000000e+00 : f32
    %77 = vector.broadcast %cst_40 : f32 to vector<8x128xf32>
    %78 = arith.addf %77, %76 : vector<8x128xf32>
    %79 = arith.mulf %68, %78 : vector<8x128xf32>
    %80 = arith.truncf %79 : vector<8x128xf32> to vector<8x128xbf16>
    %c0_41 = arith.constant 0 : index
    %c0_42 = arith.constant 0 : index
    %81 = vector.load %arg12[%c0_41, %c0_42] : memref<128x128xbf16, #tpu.memory_space<vmem>>, vector<128x128xbf16>
    %cst_43 = arith.constant dense<0.000000e+00> : vector<8x128xf32>
    %82 = tpu.matmul %80, %81, %cst_43 {dimension_numbers = #tpu.dot_dimension_numbers<[1], [0], [0], [1], [0, 0, 1, 1], [], []>} : vector<8x128xbf16>, vector<128x128xbf16>, vector<8x128xf32> -> vector<8x128xf32>
    %c0_44 = arith.constant 0 : index
    %c0_45 = arith.constant 0 : index
    %83 = vector.load %arg13[%c0_44, %c0_45] : memref<1x128xf32, #tpu.memory_space<vmem>>, vector<1x128xf32>
    %84 = vector.broadcast %83 : vector<1x128xf32> to vector<8x128xf32>
    %85 = arith.addf %82, %84 : vector<8x128xf32>
    %cst_46 = arith.constant 5.000000e-01 : f32
    %86 = vector.broadcast %cst_46 : f32 to vector<8x128xf32>
    %87 = arith.mulf %86, %85 : vector<8x128xf32>
    %88 = arith.mulf %85, %85 : vector<8x128xf32>
    %89 = arith.mulf %88, %85 : vector<8x128xf32>
    %cst_47 = arith.constant 4.471500e-02 : f32
    %90 = vector.broadcast %cst_47 : f32 to vector<8x128xf32>
    %91 = arith.mulf %90, %89 : vector<8x128xf32>
    %92 = arith.addf %85, %91 : vector<8x128xf32>
    %cst_48 = arith.constant 0.797884583 : f32
    %93 = vector.broadcast %cst_48 : f32 to vector<8x128xf32>
    %94 = arith.mulf %93, %92 : vector<8x128xf32>
    %95 = math.tanh %94 : vector<8x128xf32>
    %cst_49 = arith.constant 1.000000e+00 : f32
    %96 = vector.broadcast %cst_49 : f32 to vector<8x128xf32>
    %97 = arith.addf %96, %95 : vector<8x128xf32>
    %98 = arith.mulf %87, %97 : vector<8x128xf32>
    %99 = arith.truncf %98 : vector<8x128xf32> to vector<8x128xbf16>
    %c0_50 = arith.constant 0 : index
    %c0_51 = arith.constant 0 : index
    %100 = vector.load %arg14[%c0_50, %c0_51] : memref<128x128xbf16, #tpu.memory_space<vmem>>, vector<128x128xbf16>
    %cst_52 = arith.constant dense<0.000000e+00> : vector<8x128xf32>
    %101 = tpu.matmul %99, %100, %cst_52 {dimension_numbers = #tpu.dot_dimension_numbers<[1], [0], [0], [1], [0, 0, 1, 1], [], []>} : vector<8x128xbf16>, vector<128x128xbf16>, vector<8x128xf32> -> vector<8x128xf32>
    %c0_53 = arith.constant 0 : index
    %c0_54 = arith.constant 0 : index
    %102 = vector.load %arg15[%c0_53, %c0_54] : memref<1x128xf32, #tpu.memory_space<vmem>>, vector<1x128xf32>
    %103 = vector.broadcast %102 : vector<1x128xf32> to vector<8x128xf32>
    %104 = arith.addf %101, %103 : vector<8x128xf32>
    %c0_55 = arith.constant 0 : index
    %c0_56 = arith.constant 0 : index
    %105 = vector.load %arg16[%c0_55, %c0_56] : memref<8x128xf32, #tpu.memory_space<vmem>>, vector<8x128xf32>
    tpu.vector_store %arg16[%c0_55, %c0_56], %104 {strides = array<i32>} : memref<8x128xf32, #tpu.memory_space<vmem>>, vector<8x128xf32>,
    return
  }
  func.func @transform_0(%arg0: i32) -> (i32, i32) {
    %c0_i32 = arith.constant 0 : i32
    %c0_i32_0 = arith.constant 0 : i32
    return %arg0, %c0_i32 : i32, i32
  }
  func.func @transform_1(%arg0: i32) -> (i32, i32) {
    %c0_i32 = arith.constant 0 : i32
    %c0_i32_0 = arith.constant 0 : i32
    return %arg0, %c0_i32 : i32, i32
  }
  func.func @transform_2(%arg0: i32) -> (i32, i32) {
    %c0_i32 = arith.constant 0 : i32
    %c0_i32_0 = arith.constant 0 : i32
    %c0_i32_1 = arith.constant 0 : i32
    return %c0_i32, %c0_i32_0 : i32, i32
  }
  func.func @transform_3(%arg0: i32) -> (i32, i32) {
    %c0_i32 = arith.constant 0 : i32
    %c0_i32_0 = arith.constant 0 : i32
    %c0_i32_1 = arith.constant 0 : i32
    return %c0_i32, %c0_i32_0 : i32, i32
  }
  func.func @transform_4(%arg0: i32) -> (i32, i32) {
    %c0_i32 = arith.constant 0 : i32
    %c0_i32_0 = arith.constant 0 : i32
    %c0_i32_1 = arith.constant 0 : i32
    return %c0_i32, %c0_i32_0 : i32, i32
  }
  func.func @transform_5(%arg0: i32) -> (i32, i32) {
    %c0_i32 = arith.constant 0 : i32
    %c0_i32_0 = arith.constant 0 : i32
    %c0_i32_1 = arith.constant 0 : i32
    return %c0_i32, %c0_i32_0 : i32, i32
  }
  func.func @transform_6(%arg0: i32) -> (i32, i32) {
    %c0_i32 = arith.constant 0 : i32
    %c0_i32_0 = arith.constant 0 : i32
    %c0_i32_1 = arith.constant 0 : i32
    return %c0_i32, %c0_i32_0 : i32, i32
  }
  func.func @transform_7(%arg0: i32) -> (i32, i32) {
    %c0_i32 = arith.constant 0 : i32
    %c0_i32_0 = arith.constant 0 : i32
    %c0_i32_1 = arith.constant 0 : i32
    return %c0_i32, %c0_i32_0 : i32, i32
  }
  func.func @transform_8(%arg0: i32) -> (i32, i32) {
    %c0_i32 = arith.constant 0 : i32
    %c0_i32_0 = arith.constant 0 : i32
    %c0_i32_1 = arith.constant 0 : i32
    return %c0_i32, %c0_i32_0 : i32, i32
  }
  func.func @transform_9(%arg0: i32) -> (i32, i32) {
    %c0_i32 = arith.constant 0 : i32
    %c0_i32_0 = arith.constant 0 : i32
    %c0_i32_1 = arith.constant 0 : i32
    return %c0_i32, %c0_i32_0 : i32, i32
  }
  func.func @transform_10(%arg0: i32) -> (i32, i32) {
    %c0_i32 = arith.constant 0 : i32
    %c0_i32_0 = arith.constant 0 : i32
    %c0_i32_1 = arith.constant 0 : i32
    return %c0_i32, %c0_i32_0 : i32, i32
  }
  func.func @transform_11(%arg0: i32) -> (i32, i32) {
    %c0_i32 = arith.constant 0 : i32
    %c0_i32_0 = arith.constant 0 : i32
    %c0_i32_1 = arith.constant 0 : i32
    return %c0_i32, %c0_i32_0 : i32, i32
  }
  func.func @transform_12(%arg0: i32) -> (i32, i32) {
    %c0_i32 = arith.constant 0 : i32
    %c0_i32_0 = arith.constant 0 : i32
    %c0_i32_1 = arith.constant 0 : i32
    return %c0_i32, %c0_i32_0 : i32, i32
  }
  func.func @transform_13(%arg0: i32) -> (i32, i32) {
    %c0_i32 = arith.constant 0 : i32
    %c0_i32_0 = arith.constant 0 : i32
    %c0_i32_1 = arith.constant 0 : i32
    return %c0_i32, %c0_i32_0 : i32, i32
  }
  func.func @transform_14(%arg0: i32) -> (i32, i32) {
    %c0_i32 = arith.constant 0 : i32
    %c0_i32_0 = arith.constant 0 : i32
    %c0_i32_1 = arith.constant 0 : i32
    return %c0_i32, %c0_i32_0 : i32, i32
  }
  func.func @transform_15(%arg0: i32) -> (i32, i32) {
    %c0_i32 = arith.constant 0 : i32
    %c0_i32_0 = arith.constant 0 : i32
    return %arg0, %c0_i32 : i32, i32
  }
}

</mosaic_0001>

<bundles_post_ra>
// kernel: tpu_custom_call.1
= control target key start
LH: loop header
LB: loop body
LE: loop exit
PB: predicated region body
PF: predicated region fallthrough
CT: control target
= control target key end

     0   :  { %20 = vsyncpa [#allocation3], 0  ;;  %s1562_s0 = inlined_call_operand.hbm [shape: bf16[8,8], index: 0, kind: input, shape index: {}]   ;;  %s1563_s1 = inlined_call_operand.hbm [shape: bf16[8,8], index: 1, kind: input, shape index: {}]   ;;  %s1564_s2 = inlined_call_operand.hbm [shape: bf16[8,128], index: 2, kind: input, shape index: {}]   ;;  %s1565_s3 = inlined_call_operand.vmem [shape: bf16[8,128], index: 3, kind: input, shape index: {}]   ;;  %s1566_s4 = inlined_call_operand.vmem [shape: f32[1,128], index: 4, kind: input, shape index: {}]   ;;  %s1567_s5 = inlined_call_operand.hbm [shape: bf16[128,128], index: 5, kind: input, shape index: {}]   ;;  %s1568_s6 = inlined_call_operand.vmem [shape: f32[1,128], index: 6, kind: input, shape index: {}]   ;;  %s1569_s7 = inlined_call_operand.hbm [shape: bf16[128,128], index: 7, kind: input, shape index: {}]   ;;  %s1570_s8 = inlined_call_operand.vmem [shape: f32[1,128], index: 8, kind: input, shape index: {}]   ;;  %s1571_s9 = inlined_call_operand.hbm [shape: bf16[128,128], index: 9, kind: input, shape index: {}]   ;;  %s1572_s10 = inlined_call_operand.vmem [shape: f32[1,128], index: 10, kind: input, shape index: {}]   ;;  %s1573_s11 = inlined_call_operand.hbm [shape: bf16[128,128], index: 11, kind: input, shape index: {}]   ;;  %s1574_s12 = inlined_call_operand.vmem [shape: f32[1,128], index: 12, kind: input, shape index: {}]   ;;  %s1575_s13 = inlined_call_operand.hbm [shape: bf16[128,128], index: 13, kind: input, shape index: {}]   ;;  %s1576_s14 = inlined_call_operand.vmem [shape: f32[1,128], index: 14, kind: input, shape index: {}]   ;;  %s1577_s15 = inlined_call_operand.hbm [shape: f32[8,128], index: 15, kind: output, shape index: {}]  }
   0x1   :  { %21 = vsyncpa [#allocation6], 0 }
   0x2   :  { %22 = vsyncpa [#allocation9], 0 }
   0x3   :  { %23 = vsyncpa [#allocation12], 0 }
   0x4   :  { %24 = vsyncpa [#allocation15], 0 }
   0x5   :  { %25 = vsyncpa [#allocation4], 0  ;;  %s1350_s18 = smov [#allocation5]   ;;  %s1351_s20 = smov [#allocation8]  }
   0x6   :  { %s42_s19 = sshll.u32 %s1350_s18, 4  ;;  %s65_s21 = sshll.u32 %s1351_s20, 4  ;;  %s43_s19 = int_to_ptr.vmem [resolvable:$true] %s42_s19  ;;  %s66_s21 = int_to_ptr.vmem [resolvable:$true] %s65_s21 }
   0x7   :  { %s1166_s22 = scalar_lea.vmem %s43_s19, 64  ;;  %p1171_p1 = scmp.lt.s32.totalorder %s43_s19, %s43_s19 }
   0x8   :  { %p1167_p0 = scmp.ne.s32.totalorder %s43_s19, %s1166_s22  ;;  %p1172_p2 = scmp.lt.s32.totalorder %s1166_s22, %s1166_s22 }
   0xa   :  { %p1173_p3 = por %p1172_p2, %p1171_p1 }
   0xc   :  { %p1174_p4 = pnand %p1173_p3, %p1167_p0 }
   0xe   :  { %1177 = shalt.err (!%p1174_p4)
}
   0xf   :  { %45 = dma.hbm_to_vmem [thread:$0]  %s1563_s1, 64, %s43_s19, [#allocation6]  }
  0x10   :  { %s1186_s25 = scalar_lea.vmem %s66_s21, 1024  ;;  %p1191_p6 = scmp.lt.s32.totalorder %s66_s21, %s66_s21 }
  0x11   :  { %p1187_p5 = scmp.ne.s32.totalorder %s66_s21, %s1186_s25  ;;  %p1192_p7 = scmp.lt.s32.totalorder %s1186_s25, %s1186_s25 }
  0x13   :  { %p1193_p8 = por %p1192_p7, %p1191_p6 }
  0x15   :  { %p1194_p9 = pnand %p1193_p8, %p1187_p5 }
  0x17   :  { %1197 = shalt.err (!%p1194_p9)
}
  0x18   :  { %s1352_s26 = smov 64   ;;  %s1353_s27 = smov 4  }
  0x19   :  { %71 = dma.hbm_to_vmem [thread:$0]  %s1567_s5, 1024, %s66_s21, [#allocation9], %s1352_s26, %s1352_s26, %s1353_s27  }
  0x1a   :  { %s1354_s30 = smov [#allocation11]   ;;  %s1355_s17 = smov [#allocation2]  }
  0x1b   :  { %s93_s16 = sshll.u32 %s1354_s30, 4  ;;  %s32_s1 = sshll.u32 %s1355_s17, 4  ;;  %s94_s16 = int_to_ptr.vmem [resolvable:$true] %s93_s16  ;;  %s33_s1 = int_to_ptr.vmem [resolvable:$true] %s32_s1 }
  0x1c   :  { %s1206_s18 = scalar_lea.vmem %s94_s16, 1024  ;;  %p1211_p11 = scmp.lt.s32.totalorder %s94_s16, %s94_s16 }
  0x1d   :  { %p1207_p10 = scmp.ne.s32.totalorder %s94_s16, %s1206_s18  ;;  %p1212_p12 = scmp.lt.s32.totalorder %s1206_s18, %s1206_s18 }
  0x1f   :  { %p1213_p13 = por %p1212_p12, %p1211_p11 }
  0x21   :  { %p1214_p0 = pnand %p1213_p13, %p1207_p10 }
  0x23   :  { %1217 = shalt.err (!%p1214_p0)
}
  0x24   :  { %99 = dma.hbm_to_vmem [thread:$0]  %s1571_s9, 1024, %s94_s16, [#allocation12], %s1352_s26, %s1352_s26, %s1353_s27  }
  0x25   :  { %s1226_s5 = scalar_lea.vmem %s33_s1, 64  ;;  %p1231_p2 = scmp.lt.s32.totalorder %s33_s1, %s33_s1 }
  0x26   :  { %p1227_p1 = scmp.ne.s32.totalorder %s33_s1, %s1226_s5  ;;  %p1232_p3 = scmp.lt.s32.totalorder %s1226_s5, %s1226_s5 }
  0x28   :  { %p1233_p4 = por %p1232_p3, %p1231_p2 }
  0x2a   :  { %p1234_p5 = pnand %p1233_p4, %p1227_p1 }
  0x2c   :  { %1237 = shalt.err (!%p1234_p5)
}
  0x2d   :  { %35 = dma.hbm_to_vmem [thread:$0]  %s1562_s0, 64, %s33_s1, [#allocation3]  }
  0x2e   :  { %s1356_s23 = smov [#allocation7]   ;;  %s1357_s25 = smov [#allocation10]  }
  0x2f   :  { %s52_s24 = sshll.u32 %s1356_s23, 4  ;;  %s79_s28 = sshll.u32 %s1357_s25, 4  ;;  %s53_s24 = int_to_ptr.vmem [resolvable:$true] %s52_s24  ;;  %s80_s28 = int_to_ptr.vmem [resolvable:$true] %s79_s28 }
  0x30   :  { %s1246_s29 = scalar_lea.vmem %s53_s24, 64  ;;  %p1251_p7 = scmp.lt.s32.totalorder %s53_s24, %s53_s24 }
  0x31   :  { %p1247_p6 = scmp.ne.s32.totalorder %s53_s24, %s1246_s29  ;;  %p1252_p8 = scmp.lt.s32.totalorder %s1246_s29, %s1246_s29 }
  0x33   :  { %p1253_p9 = por %p1252_p8, %p1251_p7 }
  0x35   :  { %p1254_p10 = pnand %p1253_p9, %p1247_p6 }
  0x37   :  { %1257 = shalt.err (!%p1254_p10)
}
  0x38   :  { %55 = dma.hbm_to_vmem [thread:$0]  %s1564_s2, 64, %s53_s24, [#allocation6]  }
  0x39   :  { %s1266_s16 = scalar_lea.vmem %s80_s28, 1024  ;;  %p1271_p12 = scmp.lt.s32.totalorder %s80_s28, %s80_s28 }
  0x3a   :  { %p1267_p11 = scmp.ne.s32.totalorder %s80_s28, %s1266_s16  ;;  %p1272_p13 = scmp.lt.s32.totalorder %s1266_s16, %s1266_s16 }
  0x3c   :  { %p1273_p0 = por %p1272_p13, %p1271_p12 }
  0x3e   :  { %p1274_p1 = pnand %p1273_p0, %p1267_p11 }
  0x40   :  { %1277 = shalt.err (!%p1274_p1)
}
  0x41   :  { %85 = dma.hbm_to_vmem [thread:$0]  %s1569_s7, 1024, %s80_s28, [#allocation9], %s1352_s26, %s1352_s26, %s1353_s27  }
  0x42   :  { %s1358_s1 = smov [#allocation13]   ;;  %s1359_s19 = smov [#allocation14]  }
  0x43   :  { %s107_s18 = sshll.u32 %s1358_s1, 4  ;;  %s121_s20 = sshll.u32 %s1359_s19, 4  ;;  %s108_s18 = int_to_ptr.vmem [resolvable:$true] %s107_s18  ;;  %s122_s20 = int_to_ptr.vmem [resolvable:$true] %s121_s20 }
  0x44   :  { %s1286_s2 = scalar_lea.vmem %s108_s18, 1024  ;;  %p1291_p3 = scmp.lt.s32.totalorder %s108_s18, %s108_s18 }
  0x45   :  { %p1287_p2 = scmp.ne.s32.totalorder %s108_s18, %s1286_s2  ;;  %p1292_p4 = scmp.lt.s32.totalorder %s1286_s2, %s1286_s2 }
  0x47   :  { %p1293_p5 = por %p1292_p4, %p1291_p3 }
  0x49   :  { %p1294_p6 = pnand %p1293_p5, %p1287_p2 }
  0x4b   :  { %1297 = shalt.err (!%p1294_p6)
}
  0x4c   :  { %113 = dma.hbm_to_vmem [thread:$0]  %s1573_s11, 1024, %s108_s18, [#allocation12], %s1352_s26, %s1352_s26, %s1353_s27  }
  0x4d   :  { %s1306_s7 = scalar_lea.vmem %s122_s20, 1024  ;;  %p1311_p8 = scmp.lt.s32.totalorder %s122_s20, %s122_s20 }
  0x4e   :  { %p1307_p7 = scmp.ne.s32.totalorder %s122_s20, %s1306_s7  ;;  %p1312_p9 = scmp.lt.s32.totalorder %s1306_s7, %s1306_s7 }
  0x50   :  { %p1313_p10 = por %p1312_p9, %p1311_p8 }
  0x52   :  { %p1314_p11 = pnand %p1313_p10, %p1307_p7 }
  0x54   :  { %1317 = shalt.err (!%p1314_p11)
}
  0x55   :  { %127 = dma.hbm_to_vmem [thread:$0]  %s1575_s13, 1024, %s122_s20, [#allocation15], %s1352_s26, %s1352_s26, %s1353_s27  }
  0x56   :  { %1338 = dma.done.wait [#allocation3], 64  }
  0x57   :  { %1339 = vsyncadd [#allocation3], 4294967232 }
  0x58   :  { %1340 = dma.done.wait [#allocation6], 128  }
  0x59   :  { %1341 = vsyncadd [#allocation6], 4294967168 }
  0x5a   :  { %1342 = dma.done.wait [#allocation9], 2048  }
  0x5b   :  { %1343 = vsyncadd [#allocation9], 4294965248 }
  0x5c   :  { %1344 = dma.done.wait [#allocation12], 2048  }
  0x5d   :  { %1345 = vsyncadd [#allocation12], 4294965248 }
  0x5e   :  { %1346 = dma.done.wait [#allocation15], 1024  }
  0x5f   :  { %1347 = vsyncadd [#allocation15], 4294966272  ;;  %v1360_v0 = vmov 0.0   ;;  %vm1361_vm0 = vmmov 0   ;;  %vm163_vm1 = vcmask 1043456   ;;  %vm159_vm2 = vcmask 64512  }
  0x60   :  { %983 = vmatprep.subr.bf16.mxu1 %v1360_v0  ;;  %985 = vmatprep.mubr.msk.bf16.mxu1 %vm1361_vm0, %v1360_v0  ;;  %v156_v1 = vld [vmem:[#allocation7] sm:$0xf]  ;;  %v158_v2 = vld [vmem:[%s1565_s3] sm:$0xf]  ;;  %v157_v5 = vld [vmem:[#allocation5] sm:$0xf] }
  0x61   :  { %995 = vmatprep.subr.bf16.mxu0 %v1360_v0  ;;  %1011 = vmatprep.mubr.msk.bf16.mxu0 %vm1361_vm0, %v1360_v0  ;;  %v165_v3 = vsel %vm163_vm1, %v158_v2, 0  ;;  %v211_v4 = vsel %vm163_vm1, %v156_v1, 0  ;;  %v155_v6 = vld [vmem:[#allocation2] sm:$0xf]  ;;  %v1108_v7 = vld [vmem:[#allocation8 + $0x38] sm:$0xff]   ;;  %v1110_v9 = vld [vmem:[#allocation8 + $0x28] sm:$0xff]  }
  0x62   :  { %984 = vmatpush3.bf16.msra.mxu1 %v165_v3  ;;  %996 = vmatpush3.bf16.msra.mxu0 %v1108_v7  ;;  %v1109_v8 = vld [vmem:[#allocation8 + $0x30] sm:$0xff]   ;;  %v1111_v10 = vld [vmem:[#allocation8 + $0x20] sm:$0xff]   ;;  %v1112_v11 = vld [vmem:[#allocation8 + $0x18] sm:$0xff]  }
  0x63   :  { %989 = vmatprep.subr.bf16.mxu1 %v1360_v0  ;;  %997 = vmatprep.subr.bf16.mxu0 %v1360_v0  ;;  %v1113_v12 = vld [vmem:[#allocation8 + $0x10] sm:$0xff]   ;;  %v1114_v13 = vld [vmem:[#allocation8 + $0x8] sm:$0xff]   ;;  %v1115_v14 = vld [vmem:[#allocation8] sm:$0xff]  }
  0x64   :  { %v888_v20 = vld [vmem:[%s1566_s4] ss:$0 sm:$0xff]  ;;  %v1116_v36 = vld [vmem:[#allocation10 + $0x38] sm:$0xff]   ;;  %v1118_v38 = vld [vmem:[#allocation10 + $0x28] sm:$0xff]  }
  0x65   :  { %986 = vmatmul.mubr.msk.bf16.vlgmr.msra.gmra.mxu1 %vm159_vm2, %v157_v5  ;;  %v1117_v37 = vld [vmem:[#allocation10 + $0x30] sm:$0xff]   ;;  %v1119_v39 = vld [vmem:[#allocation10 + $0x20] sm:$0xff]   ;;  %v1120_v40 = vld [vmem:[#allocation10 + $0x18] sm:$0xff]  }
  0x66   :  { %990 = vmatpush3.bf16.msra.mxu1 %v211_v4  ;;  %991 = vmatprep.mubr.msk.bf16.mxu1 %vm1361_vm0, %v1360_v0  ;;  %v1121_v41 = vld [vmem:[#allocation10 + $0x10] sm:$0xff]   ;;  %v1122_v42 = vld [vmem:[#allocation10 + $0x8] sm:$0xff]   ;;  %v1123_v43 = vld [vmem:[#allocation10] sm:$0xff]  }
  0x67   :  { %1015 = vmatprep.subr.bf16.mxu1 %v1360_v0  ;;  %998 = vmatpush3.bf16.msra.mxu0 %v1109_v8  ;;  %v889_v44 = vld [vmem:[%s1568_s6] ss:$0 sm:$0xff]  ;;  %v1124_v60 = vld [vmem:[#allocation11 + $0x38] sm:$0xff]   ;;  %v1126_v62 = vld [vmem:[#allocation11 + $0x28] sm:$0xff]  }
  0x68   :  { %999 = vmatprep.subr.bf16.mxu0 %v1360_v0  ;;  %v1125_v61 = vld [vmem:[#allocation11 + $0x30] sm:$0xff]   ;;  %v1127_v63 = vld [vmem:[#allocation11 + $0x20] sm:$0xff]   ;;  %v1128_v1 = vld [vmem:[#allocation11 + $0x18] sm:$0xff]  }
  0x69   :  { %v1129_v2 = vld [vmem:[#allocation11 + $0x10] sm:$0xff]   ;;  %v1130_v3 = vld [vmem:[#allocation11 + $0x8] sm:$0xff]   ;;  %v1131_v4 = vld [vmem:[#allocation11] sm:$0xff]  }
  0x6a   :  { %v898_v5 = vld [vmem:[%s1570_s8] ss:$0 sm:$0xff] }
  0x6b   :  { %1000 = vmatpush3.bf16.msra.mxu0 %v1110_v9 }
  0x6c   :  { %1001 = vmatprep.subr.bf16.mxu0 %v1360_v0 }
  0x6d   :  { %992 = vmatmul.mubr.msk.bf16.vlgmr.msra.gmra.mxu1 %vm159_vm2, %v155_v6 }
  0x6e   :  { %1031 = vmatprep.mubr.msk.bf16.mxu1 %vm1361_vm0, %v1360_v0  ;;  %1016 = vmatpush3.bf16.msra.mxu1 %v1116_v36 }
  0x6f   :  { %1002 = vmatpush3.bf16.msra.mxu0 %v1111_v10  ;;  %1017 = vmatprep.subr.bf16.mxu1 %v1360_v0 }
  0x70   :  { %1003 = vmatprep.subr.bf16.mxu0 %v1360_v0 }
  0x72   :  { %1018 = vmatpush3.bf16.msra.mxu1 %v1117_v37 }
  0x73   :  { %1004 = vmatpush3.bf16.msra.mxu0 %v1112_v11  ;;  %1019 = vmatprep.subr.bf16.mxu1 %v1360_v0 }
  0x74   :  { %1005 = vmatprep.subr.bf16.mxu0 %v1360_v0 }
  0x76   :  { %1020 = vmatpush3.bf16.msra.mxu1 %v1118_v38 }
  0x77   :  { %1006 = vmatpush3.bf16.msra.mxu0 %v1113_v12  ;;  %1021 = vmatprep.subr.bf16.mxu1 %v1360_v0 }
  0x78   :  { %1007 = vmatprep.subr.bf16.mxu0 %v1360_v0 }
  0x7a   :  { %1022 = vmatpush3.bf16.msra.mxu1 %v1119_v39 }
  0x7b   :  { %1008 = vmatpush3.bf16.msra.mxu0 %v1114_v13  ;;  %1023 = vmatprep.subr.bf16.mxu1 %v1360_v0 }
  0x7c   :  { %1009 = vmatprep.subr.bf16.mxu0 %v1360_v0 }
  0x7e   :  { %1024 = vmatpush3.bf16.msra.mxu1 %v1120_v40 }
  0x7f   :  { %1010 = vmatpush3.bf16.msra.mxu0 %v1115_v14  ;;  %1025 = vmatprep.subr.bf16.mxu1 %v1360_v0 }
  0x80   :  { %1035 = vmatprep.subr.bf16.mxu0 %v1360_v0 }
  0x82   :  { %1026 = vmatpush3.bf16.msra.mxu1 %v1121_v41 }
  0x83   :  { %1027 = vmatprep.subr.bf16.mxu1 %v1360_v0 }
  0x86   :  { %1028 = vmatpush3.bf16.msra.mxu1 %v1122_v42 }
  0x87   :  { %1029 = vmatprep.subr.bf16.mxu1 %v1360_v0 }
  0x8a   :  { %1030 = vmatpush3.bf16.msra.mxu1 %v1123_v43 }
  0x8b   :  { %1055 = vmatprep.subr.bf16.mxu1 %v1360_v0 }
 0x125   :  { %v201_v15 = vpop.f32.mrf.mxu1 }
 0x127   :  { %v987_v16 = vpop.f32.mrf.mxu1 }
 0x129   :  { %v204_v17 = vpop.f32.mrf.mxu1 }
 0x12b   :  { %v988_v18 = vpop.f32.mrf.mxu1 }
 0x12d   :  { %v247_v19 = vpop.f32.mrf.mxu1 }
 0x12e   :  { %v248_v21 = vadd.f32 %v247_v19, %v201_v15 }
 0x12f   :  { %v993_v22 = vpop.f32.mrf.mxu1 }
 0x130   :  { %v260_v23 = vadd.f32 %v888_v20, %v248_v21  ;;  %v1132_v21 = vld [vmem:[#allocation13 + $0x38] sm:$0xff]   ;;  %v1133_v22 = vld [vmem:[#allocation13 + $0x30] sm:$0xff]  }
 0x131   :  { %v250_v24 = vpop.f32.mrf.mxu1 }
 0x132   :  { %v262_v25 = vmul.f32 %v260_v23, %v260_v23  ;;  %v261_v32 = vmul.f32 0.5, %v260_v23  ;;  %v1135_v24 = vld [vmem:[#allocation13 + $0x20] sm:$0xff]  }
 0x133   :  { %v994_v26 = vpop.f32.mrf.mxu1 }
 0x134   :  { %v263_v27 = vmul.f32 %v262_v25, %v260_v23  ;;  %v1136_v25 = vld [vmem:[#allocation13 + $0x18] sm:$0xff]   ;;  %v1137_v26 = vld [vmem:[#allocation13 + $0x10] sm:$0xff]  }
 0x136   :  { %v264_v28 = vmul.f32 0.044715, %v263_v27  ;;  %v1138_v27 = vld [vmem:[#allocation13 + $0x8] sm:$0xff]  }
 0x138   :  { %v265_v29 = vadd.f32 %v264_v28, %v260_v23  ;;  %v1134_v23 = vld [vmem:[#allocation13 + $0x28] sm:$0xff]   ;;  %v1139_v28 = vld [vmem:[#allocation13] sm:$0xff]  }
 0x13a   :  { %v266_v30 = vmul.f32 0.7978846, %v265_v29  ;;  %v907_v29 = vld [vmem:[%s1572_s10] ss:$0 sm:$0xff] }
 0x13c   :  { %1148 = vtanh.f32 %v266_v30 }
 0x149   :  { %v1149_v31 = vpop.eup %1148 }
 0x14a   :  { %v268_v33 = vadd.f32 1.0, %v1149_v31 }
 0x14c   :  { %v269_v34 = vmul.f32 %v268_v33, %v261_v32 }
 0x14e   :  { %v270_v35 = vpack.c.bf16 %v269_v34, %v269_v34 }
 0x150   :  { %1012 = vmatmul.mubr.bf16.vlgmr.msra.gmra.mxu0 %v270_v35 }
 0x151   :  { %1051 = vmatprep.mubr.msk.bf16.mxu0 %vm1361_vm0, %v1360_v0  ;;  %1036 = vmatpush3.bf16.msra.mxu0 %v1124_v60 }
 0x152   :  { %1037 = vmatprep.subr.bf16.mxu0 %v1360_v0 }
 0x155   :  { %1038 = vmatpush3.bf16.msra.mxu0 %v1125_v61 }
 0x156   :  { %1039 = vmatprep.subr.bf16.mxu0 %v1360_v0 }
 0x159   :  { %1040 = vmatpush3.bf16.msra.mxu0 %v1126_v62 }
 0x15a   :  { %1041 = vmatprep.subr.bf16.mxu0 %v1360_v0 }
 0x15d   :  { %1042 = vmatpush3.bf16.msra.mxu0 %v1127_v63 }
 0x15e   :  { %1043 = vmatprep.subr.bf16.mxu0 %v1360_v0 }
 0x161   :  { %1044 = vmatpush3.bf16.msra.mxu0 %v1128_v1 }
 0x162   :  { %1045 = vmatprep.subr.bf16.mxu0 %v1360_v0 }
 0x165   :  { %1046 = vmatpush3.bf16.msra.mxu0 %v1129_v2 }
 0x166   :  { %1047 = vmatprep.subr.bf16.mxu0 %v1360_v0 }
 0x169   :  { %1048 = vmatpush3.bf16.msra.mxu0 %v1130_v3 }
 0x16a   :  { %1049 = vmatprep.subr.bf16.mxu0 %v1360_v0 }
 0x16d   :  { %1050 = vmatpush3.bf16.msra.mxu0 %v1131_v4 }
 0x16e   :  { %1075 = vmatprep.subr.bf16.mxu0 %v1360_v0 }
 0x210   :  { %v376_v45 = vpop.f32.mrf.mxu0 }
 0x211   :  { %v377_v46 = vadd.f32 %v889_v44, %v376_v45  ;;  %v1140_v45 = vld [vmem:[#allocation14 + $0x38] sm:$0xff]  }
 0x212   :  { %v1013_v47 = vpop.f32.mrf.mxu0 }
 0x213   :  { %v383_v48 = vmul.f32 %v377_v46, %v377_v46  ;;  %v382_v56 = vmul.f32 0.5, %v377_v46  ;;  %v1142_v47 = vld [vmem:[#allocation14 + $0x28] sm:$0xff]  }
 0x214   :  { %v379_v49 = vpop.f32.mrf.mxu0 }
 0x215   :  { %v384_v50 = vmul.f32 %v383_v48, %v377_v46  ;;  %v1143_v48 = vld [vmem:[#allocation14 + $0x20] sm:$0xff]   ;;  %v1144_v49 = vld [vmem:[#allocation14 + $0x18] sm:$0xff]  }
 0x216   :  { %v1014_v51 = vpop.f32.mrf.mxu0 }
 0x217   :  { %v385_v52 = vmul.f32 0.044715, %v384_v50  ;;  %v1145_v50 = vld [vmem:[#allocation14 + $0x10] sm:$0xff]   ;;  %v1146_v51 = vld [vmem:[#allocation14 + $0x8] sm:$0xff]  }
 0x219   :  { %v386_v53 = vadd.f32 %v385_v52, %v377_v46  ;;  %v1141_v46 = vld [vmem:[#allocation14 + $0x30] sm:$0xff]   ;;  %v1147_v52 = vld [vmem:[#allocation14] sm:$0xff]  }
 0x21b   :  { %v387_v54 = vmul.f32 0.7978846, %v386_v53  ;;  %v916_v53 = vld [vmem:[%s1574_s12] ss:$0 sm:$0xff]  ;;  %s1362_s12 = smov [#allocation16]  }
 0x21c   :  { %s873_s30 = sshll.u32 %s1362_s12, 4  ;;  %s874_s30 = int_to_ptr.vmem [resolvable:$true] %s873_s30 }
 0x21d   :  { %1150 = vtanh.f32 %v387_v54  ;;  %s1318_s16 = scalar_lea.vmem %s874_s30, 128  ;;  %p1323_p13 = scmp.lt.s32.totalorder %s874_s30, %s874_s30 }
 0x21e   :  { %p1319_p12 = scmp.ne.s32.totalorder %s874_s30, %s1318_s16  ;;  %p1324_p0 = scmp.lt.s32.totalorder %s1318_s16, %s1318_s16 }
 0x220   :  { %p1325_p1 = por %p1324_p0, %p1323_p13 }
 0x222   :  { %p1326_p2 = pnand %p1325_p1, %p1319_p12 }
 0x22a   :  { %v1151_v55 = vpop.eup %1150 }
 0x22b   :  { %v389_v57 = vadd.f32 1.0, %v1151_v55 }
 0x22d   :  { %v390_v58 = vmul.f32 %v389_v57, %v382_v56 }
 0x22f   :  { %v391_v59 = vpack.c.bf16 %v390_v58, %v390_v58 }
 0x231   :  { %1032 = vmatmul.mubr.bf16.vlgmr.msra.gmra.mxu1 %v391_v59 }
 0x232   :  { %1071 = vmatprep.mubr.msk.bf16.mxu1 %vm1361_vm0, %v1360_v0  ;;  %1056 = vmatpush3.bf16.msra.mxu1 %v1132_v21 }
 0x233   :  { %1057 = vmatprep.subr.bf16.mxu1 %v1360_v0 }
 0x236   :  { %1058 = vmatpush3.bf16.msra.mxu1 %v1133_v22 }
 0x237   :  { %1059 = vmatprep.subr.bf16.mxu1 %v1360_v0 }
 0x23a   :  { %1060 = vmatpush3.bf16.msra.mxu1 %v1134_v23 }
 0x23b   :  { %1061 = vmatprep.subr.bf16.mxu1 %v1360_v0 }
 0x23e   :  { %1062 = vmatpush3.bf16.msra.mxu1 %v1135_v24 }
 0x23f   :  { %1063 = vmatprep.subr.bf16.mxu1 %v1360_v0 }
 0x242   :  { %1064 = vmatpush3.bf16.msra.mxu1 %v1136_v25 }
 0x243   :  { %1065 = vmatprep.subr.bf16.mxu1 %v1360_v0 }
 0x246   :  { %1066 = vmatpush3.bf16.msra.mxu1 %v1137_v26 }
 0x247   :  { %1067 = vmatprep.subr.bf16.mxu1 %v1360_v0 }
 0x24a   :  { %1068 = vmatpush3.bf16.msra.mxu1 %v1138_v27 }
 0x24b   :  { %1069 = vmatprep.subr.bf16.mxu1 %v1360_v0 }
 0x24e   :  { %1070 = vmatpush3.bf16.msra.mxu1 %v1139_v28 }
 0x2f1   :  { %v497_v6 = vpop.f32.mrf.mxu1 }
 0x2f2   :  { %v498_v7 = vadd.f32 %v898_v5, %v497_v6  ;;  %v925_v5 = vld [vmem:[%s1576_s14] ss:$0 sm:$0xff] }
 0x2f3   :  { %v1033_v8 = vpop.f32.mrf.mxu1 }
 0x2f4   :  { %v504_v9 = vmul.f32 %v498_v7, %v498_v7  ;;  %v503_v17 = vmul.f32 0.5, %v498_v7 }
 0x2f5   :  { %v500_v10 = vpop.f32.mrf.mxu1 }
 0x2f6   :  { %v505_v11 = vmul.f32 %v504_v9, %v498_v7 }
 0x2f7   :  { %v1034_v12 = vpop.f32.mrf.mxu1 }
 0x2f8   :  { %v506_v13 = vmul.f32 0.044715, %v505_v11 }
 0x2fa   :  { %v507_v14 = vadd.f32 %v506_v13, %v498_v7 }
 0x2fc   :  { %v508_v15 = vmul.f32 0.7978846, %v507_v14 }
 0x2fe   :  { %1152 = vtanh.f32 %v508_v15 }
 0x30b   :  { %v1153_v16 = vpop.eup %1152 }
 0x30c   :  { %v510_v18 = vadd.f32 1.0, %v1153_v16 }
 0x30e   :  { %v511_v19 = vmul.f32 %v510_v18, %v503_v17 }
 0x310   :  { %v512_v20 = vpack.c.bf16 %v511_v19, %v511_v19 }
 0x312   :  { %1052 = vmatmul.mubr.bf16.vlgmr.msra.gmra.mxu0 %v512_v20 }
 0x313   :  { %1091 = vmatprep.mubr.msk.bf16.mxu0 %vm1361_vm0, %v1360_v0  ;;  %1076 = vmatpush3.bf16.msra.mxu0 %v1140_v45 }
 0x314   :  { %1077 = vmatprep.subr.bf16.mxu0 %v1360_v0 }
 0x317   :  { %1078 = vmatpush3.bf16.msra.mxu0 %v1141_v46 }
 0x318   :  { %1079 = vmatprep.subr.bf16.mxu0 %v1360_v0 }
 0x31b   :  { %1080 = vmatpush3.bf16.msra.mxu0 %v1142_v47 }
 0x31c   :  { %1081 = vmatprep.subr.bf16.mxu0 %v1360_v0 }
 0x31f   :  { %1082 = vmatpush3.bf16.msra.mxu0 %v1143_v48 }
 0x320   :  { %1083 = vmatprep.subr.bf16.mxu0 %v1360_v0 }
 0x323   :  { %1084 = vmatpush3.bf16.msra.mxu0 %v1144_v49 }
 0x324   :  { %1085 = vmatprep.subr.bf16.mxu0 %v1360_v0 }
 0x327   :  { %1086 = vmatpush3.bf16.msra.mxu0 %v1145_v50 }
 0x328   :  { %1087 = vmatprep.subr.bf16.mxu0 %v1360_v0 }
 0x32b   :  { %1088 = vmatpush3.bf16.msra.mxu0 %v1146_v51 }
 0x32c   :  { %1089 = vmatprep.subr.bf16.mxu0 %v1360_v0 }
 0x32f   :  { %1090 = vmatpush3.bf16.msra.mxu0 %v1147_v52 }
 0x3d2   :  { %v618_v30 = vpop.f32.mrf.mxu0 }
 0x3d3   :  { %v619_v31 = vadd.f32 %v907_v29, %v618_v30 }
 0x3d4   :  { %v1053_v32 = vpop.f32.mrf.mxu0 }
 0x3d5   :  { %v625_v33 = vmul.f32 %v619_v31, %v619_v31  ;;  %v624_v41 = vmul.f32 0.5, %v619_v31 }
 0x3d6   :  { %v621_v34 = vpop.f32.mrf.mxu0 }
 0x3d7   :  { %v626_v35 = vmul.f32 %v625_v33, %v619_v31 }
 0x3d8   :  { %v1054_v36 = vpop.f32.mrf.mxu0 }
 0x3d9   :  { %v627_v37 = vmul.f32 0.044715, %v626_v35 }
 0x3db   :  { %v628_v38 = vadd.f32 %v627_v37, %v619_v31 }
 0x3dd   :  { %v629_v39 = vmul.f32 0.7978846, %v628_v38 }
 0x3df   :  { %1154 = vtanh.f32 %v629_v39 }
 0x3ec   :  { %v1155_v40 = vpop.eup %1154 }
 0x3ed   :  { %v631_v42 = vadd.f32 1.0, %v1155_v40 }
 0x3ef   :  { %v632_v43 = vmul.f32 %v631_v42, %v624_v41 }
 0x3f1   :  { %v633_v44 = vpack.c.bf16 %v632_v43, %v632_v43 }
 0x3f3   :  { %1072 = vmatmul.mubr.bf16.vlgmr.msra.gmra.mxu1 %v633_v44 }
 0x4b3   :  { %v739_v54 = vpop.f32.mrf.mxu1 }
 0x4b4   :  { %v740_v55 = vadd.f32 %v916_v53, %v739_v54 }
 0x4b5   :  { %v1073_v56 = vpop.f32.mrf.mxu1 }
 0x4b6   :  { %v746_v57 = vmul.f32 %v740_v55, %v740_v55  ;;  %v745_v2 = vmul.f32 0.5, %v740_v55 }
 0x4b7   :  { %v742_v58 = vpop.f32.mrf.mxu1 }
 0x4b8   :  { %v747_v59 = vmul.f32 %v746_v57, %v740_v55 }
 0x4b9   :  { %v1074_v60 = vpop.f32.mrf.mxu1 }
 0x4ba   :  { %v748_v61 = vmul.f32 0.044715, %v747_v59 }
 0x4bc   :  { %v749_v62 = vadd.f32 %v748_v61, %v740_v55 }
 0x4be   :  { %v750_v63 = vmul.f32 0.7978846, %v749_v62 }
 0x4c0   :  { %1156 = vtanh.f32 %v750_v63 }
 0x4cd   :  { %v1157_v1 = vpop.eup %1156 }
 0x4ce   :  { %v752_v3 = vadd.f32 1.0, %v1157_v1 }
 0x4d0   :  { %v753_v0 = vmul.f32 %v752_v3, %v745_v2 }
 0x4d2   :  { %v754_v4 = vpack.c.bf16 %v753_v0, %v753_v0 }
 0x4d4   :  { %1092 = vmatmul.mubr.bf16.vlgmr.msra.gmra.mxu0 %v754_v4 }
 0x594   :  { %v860_v6 = vpop.f32.mrf.mxu0 }
 0x595   :  { %v861_v7 = vadd.f32 %v925_v5, %v860_v6 }
 0x596   :  { %v1093_v8 = vpop.f32.mrf.mxu0 }
 0x597   :  { %866 = vst [vmem:[#allocation16] sm:$0xff] %v861_v7 }
 0x598   :  { %v863_v9 = vpop.f32.mrf.mxu0 }
 0x599   :  { %1329 = shalt.err (!%p1326_p2)
}
 0x59a   :  { %876 = dma.vmem_to_hbm [thread:$0]  %s874_s30, 128, %s1577_s15, [#allocation4]   ;;  %v1094_v10 = vpop.f32.mrf.mxu0 }
 0x59b   :  { %1348 = dma.done.wait [#allocation4], 128  }
 0x59c   :  { %1349 = vsyncadd [#allocation4], 4294967168 }
 0x59d   :  { %880 = vsyncpa [#allocation3], 1 }
 0x59e   :  { %881 = vsyncpa [#allocation6], 1 }
 0x59f   :  { %882 = vsyncpa [#allocation9], 1 }
 0x5a0   :  { %883 = vsyncpa [#allocation12], 1 }
 0x5a1   :  { %884 = vsyncpa [#allocation15], 1 }
 0x5a2   :  { %885 = vsyncpa [#allocation4], 1 }

</bundles_post_ra>
